<compile_context>
chip_gen: v7x
topology: tpu7x:2x2x1
jax: 0.10.0
libtpu: 0.0.40
codegen_flags: <defaults>
</compile_context>

<pallas_src>
import jax
import jax.numpy as jnp
from jax import lax
from jax.experimental import pallas as pl
from jax.experimental.pallas import tpu as pltpu

_LANE = 128


def _round_up(x, m):
    return ((x + m - 1) // m) * m


def _round_down(x, m):
    return (x // m) * m


def _sublane_multiple(dtype):
    itemsize = jnp.dtype(dtype).itemsize
    return 8 * max(1, 4 // itemsize)  # 8 for f32, 16 for bf16, 32 for int8


def _vmem_caps():
    """(physical VMEM bytes, pipelined-input budget bytes), generation-aware."""
    try:
        cap = int(pltpu.get_tpu_info().vmem_capacity_bytes)
    except Exception:  # interpret mode / older jax: assume the smallest (v7x)
        cap = 64 * 1024 * 1024
    budget = max(16 * 1024 * 1024, cap // 2)  # 64 MiB v5e/v6e, 32 MiB v7x
    return cap, budget


def _triplet_loss_jax(anchor, positive, negative, margin):
    a = anchor.astype(jnp.float32)
    p = positive.astype(jnp.float32)
    n = negative.astype(jnp.float32)
    dp = jnp.sum((a - p) ** 2, axis=1)
    dn = jnp.sum((a - n) ** 2, axis=1)
    return jnp.mean(jnp.maximum(dp - dn + jnp.float32(margin), 0.0))


def _make_kernel(margin, batch, d_total, tile_b, tile_d, n_d_tiles):
    margin = float(margin)
    d_ragged = (d_total % tile_d) != 0
    b_ragged = (batch % tile_b) != 0
    single_d = n_d_tiles == 1

    def finalize(d, out_ref):
        # d: (tile_b, 1) f32 of (dp - dn) per row.
        losses = jnp.maximum(d + jnp.float32(margin), jnp.float32(0.0))
        if b_ragged:
            row = (lax.broadcasted_iota(jnp.int32, (tile_b, 1), 0)
                   + pl.program_id(0) * tile_b)
            losses = jnp.where(row < batch, losses, jnp.float32(0.0))
        total = jnp.sum(losses)                       # per-tile partial sum
        out_ref[...] = jnp.broadcast_to(total, out_ref.shape)

    def kernel(a_ref, p_ref, n_ref, out_ref, acc_ref):
        k = pl.program_id(1)

        # Subtract in the input dtype (bf16-native VPU on v6e/v7x); widen to
        # f32 for squaring / accumulation.
        dpos = (a_ref[...] - p_ref[...]).astype(jnp.float32)
        dneg = (a_ref[...] - n_ref[...]).astype(jnp.float32)
        fused = dpos * dpos - dneg * dneg             # (tile_b, tile_d) f32

        if d_ragged:
            col = lax.broadcasted_iota(jnp.int32, fused.shape, 1) + k * tile_d
            fused = jnp.where(col < d_total, fused, jnp.float32(0.0))

        # Cross-lane reduction on the (otherwise idle) MXU, not the XLU.
        ones = jnp.ones((tile_d, 1), jnp.float32)
        part = jnp.dot(fused, ones, preferred_element_type=jnp.float32)

        if single_d:
            finalize(part, out_ref)
        else:
            @pl.when(k == 0)
            def _init():
                acc_ref[...] = jnp.zeros_like(acc_ref)

            acc_ref[...] += part

            @pl.when(k == n_d_tiles - 1)
            def _done():
                finalize(acc_ref[...], out_ref)

    return kernel


def triplet_loss(anchor, positive, negative, margin=1.0,
                 tile_b=None, tile_d=None, min_kernel_bytes=192 * 1024):
    """Pallas implementation of TripletLoss.forward. Returns a scalar (f32)."""
    B, D = anchor.shape
    assert positive.shape == (B, D) and negative.shape == (B, D)
    assert positive.dtype == anchor.dtype and negative.dtype == anchor.dtype
    itemsize = jnp.dtype(anchor.dtype).itemsize

    # Tiny inputs: pallas_call launch / pipeline setup dominates; XLA's fused
    # elementwise path is faster and needs no tiling logic.
    if tile_b is None and tile_d is None and 3 * B * D * itemsize < min_kernel_bytes:
        return _triplet_loss_jax(anchor, positive, negative, margin)

    sub = _sublane_multiple(anchor.dtype)
    cap, budget = _vmem_caps()
    bytes_per_elem = 3 * 2 * itemsize          # 3 inputs, double-buffered

    # ---- feature tiling: keep D whole unless it would blow the budget ----
    if tile_d is None:
        if bytes_per_elem * max(sub, 256) * D <= budget:
            tile_d = D
        else:
            # Very wide embeddings: reduction grid axis over D, lane-aligned
            # tiles, while keeping the batch tile >= 256 rows.
            tile_d = max(_LANE, _round_down(budget // (bytes_per_elem * 256), _LANE))
            if tile_d >= D:
                tile_d = D
    else:
        tile_d = min(int(tile_d), D)
        if tile_d != D:
            tile_d = max(_LANE, _round_down(tile_d, _LANE))
    n_d = pl.cdiv(D, tile_d)

    # ---- batch tiling: as large as the budget allows (multi-MiB blocks) ----
    if tile_b is None:
        max_rows = _round_down(budget // (bytes_per_elem * tile_d), sub)
        tile_b = max(sub, min(max_rows, _round_up(B, sub), 8192))
    else:
        tile_b = max(sub, _round_up(min(int(tile_b), _round_up(B, sub)), sub))
    n_b = pl.cdiv(B, tile_b)

    inputs_bytes = bytes_per_elem * tile_b * tile_d
    vmem_limit = int(min(cap, max(32 * 1024 * 1024,
                                  inputs_bytes + 8 * 1024 * 1024)))

    in_spec = pl.BlockSpec((tile_b, tile_d), lambda i, k: (i, k))
    out_spec = pl.BlockSpec((1, 8, _LANE), lambda i, k: (i, 0, 0))

    partials = pl.pallas_call(
        _make_kernel(margin, B, D, tile_b, tile_d, n_d),
        out_shape=jax.ShapeDtypeStruct((n_b, 8, _LANE), jnp.float32),
        grid_spec=pltpu.PrefetchScalarGridSpec(
            num_scalar_prefetch=0,
            grid=(n_b, n_d),
            in_specs=[in_spec, in_spec, in_spec],
            out_specs=out_spec,
            scratch_shapes=[pltpu.VMEM((tile_b, 1), jnp.float32)],
        ),
        compiler_params=pltpu.CompilerParams(
            # Batch axis carries no state -> parallel (both TCs on v7x).
            # The D axis carries the accumulator / resident output -> arbitrary.
            dimension_semantics=("parallel", "arbitrary"),
            vmem_limit_bytes=vmem_limit,
        ),
    )(anchor, positive, negative)

    # Tiny final reduction over per-tile partial sums (pad/ragged rows were
    # already masked in-kernel), then the mean over the B real rows.
    return jnp.sum(partials[:, 0, 0]) / jnp.float32(B)


if __name__ == "__main__":
    key = jax.random.PRNGKey(0)

    def ref(a, p, n, margin):
        dp = jnp.sum((a - p) ** 2, axis=1)
        dn = jnp.sum((a - n) ** 2, axis=1)
        return jnp.mean(jnp.maximum(dp - dn + margin, 0.0))

    def check(B, D, margin=1.0, **kw):
        k1, k2, k3 = jax.random.split(jax.random.fold_in(key, 131 * B + D), 3)
        a = jax.random.normal(k1, (B, D), dtype=jnp.float32)
        p = jax.random.normal(k2, (B, D), dtype=jnp.float32)
        n = jax.random.normal(k3, (B, D), dtype=jnp.float32)
        out = jax.block_until_ready(triplet_loss(a, p, n, margin=margin, **kw))
        r = ref(a, p, n, margin)
        assert jnp.allclose(out, r, rtol=1e-3, atol=1e-3), (B, D, kw, out, r)

    # Single-tile, aligned batch (main Pallas path).
    check(256, 128)
    # Ragged batch + several batch tiles (forced small tile) -> row masking.
    check(300, 192, margin=0.5, tile_b=128)
    # Wide-feature path: D-reduction grid axis with VMEM accumulator, ragged D.
    check(256, 320, tile_d=128)
    # Tiny input -> pure-JAX fast path.
    check(16, 128)

    print("KERNEL_OK")
</pallas_src>

<mosaic_0001>
module attributes {stable_mosaic.version = 11 : i64} {
  func.func @kernel(%arg0: i32, %arg1: i32, %arg2: memref<256x128xf32, #tpu.memory_space<vmem>>, %arg3: memref<256x128xf32, #tpu.memory_space<vmem>>, %arg4: memref<256x128xf32, #tpu.memory_space<vmem>>, %arg5: memref<1x8x128xf32, #tpu.memory_space<vmem>>, %arg6: memref<256x1xf32, #tpu.memory_space<vmem>>) attributes {dimension_semantics = [#tpu.dimension_semantics<parallel>, #tpu.dimension_semantics<arbitrary>], iteration_bounds = array<i64: 1, 1>, scalar_prefetch = 0 : i64, scratch_operands = 1 : i64, tpu.core_type = #tpu.core_type<tc>, window_params = [{transform_indices = @transform_0, window_bounds = array<i64: 256, 128>}, {transform_indices = @transform_1, window_bounds = array<i64: 256, 128>}, {transform_indices = @transform_2, window_bounds = array<i64: 256, 128>}, {transform_indices = @transform_3, window_bounds = array<i64: 1, 8, 128>}]} {
    %c0 = arith.constant 0 : index
    %c0_0 = arith.constant 0 : index
    %0 = vector.load %arg2[%c0, %c0_0] : memref<256x128xf32, #tpu.memory_space<vmem>>, vector<256x128xf32>
    %c0_1 = arith.constant 0 : index
    %c0_2 = arith.constant 0 : index
    %1 = vector.load %arg3[%c0_1, %c0_2] : memref<256x128xf32, #tpu.memory_space<vmem>>, vector<256x128xf32>
    %2 = arith.subf %0, %1 : vector<256x128xf32>
    %c0_3 = arith.constant 0 : index
    %c0_4 = arith.constant 0 : index
    %3 = vector.load %arg2[%c0_3, %c0_4] : memref<256x128xf32, #tpu.memory_space<vmem>>, vector<256x128xf32>
    %c0_5 = arith.constant 0 : index
    %c0_6 = arith.constant 0 : index
    %4 = vector.load %arg4[%c0_5, %c0_6] : memref<256x128xf32, #tpu.memory_space<vmem>>, vector<256x128xf32>
    %5 = arith.subf %3, %4 : vector<256x128xf32>
    %6 = arith.mulf %2, %2 : vector<256x128xf32>
    %7 = arith.mulf %5, %5 : vector<256x128xf32>
    %8 = arith.subf %6, %7 : vector<256x128xf32>
    %cst = arith.constant 1.000000e+00 : f32
    %9 = vector.broadcast %cst : f32 to vector<128x1xf32>
    %cst_7 = arith.constant dense<0.000000e+00> : vector<256x1xf32>
    %10 = tpu.matmul %8, %9, %cst_7 {dimension_numbers = #tpu.dot_dimension_numbers<[1], [0], [0], [1], [0, 0, 1, 1], [], []>} : vector<256x128xf32>, vector<128x1xf32>, vector<256x1xf32> -> vector<256x1xf32>
    %cst_8 = arith.constant 1.000000e+00 : f32
    %11 = vector.broadcast %cst_8 : f32 to vector<256x1xf32>
    %12 = arith.addf %10, %11 : vector<256x1xf32>
    %cst_9 = arith.constant 0.000000e+00 : f32
    %13 = vector.broadcast %cst_9 : f32 to vector<256x1xf32>
    %14 = arith.maximumf %12, %13 : vector<256x1xf32>
    %15 = vector.shape_cast %14 : vector<256x1xf32> to vector<1x256x1xf32>
    %cst_10 = arith.constant dense<0.000000e+00> : vector<1xf32>
    %16 = vector.multi_reduction <add>, %15, %cst_10 [1, 2] : vector<1x256x1xf32> to vector<1xf32>
    %17 = vector.shape_cast %16 : vector<1xf32> to vector<1x1x1xf32>
    %18 = vector.extract %17[0, 0, 0] : f32 from vector<1x1x1xf32>
    %19 = vector.broadcast %18 : f32 to vector<1x8x128xf32>
    %c0_11 = arith.constant 0 : index
    %c0_12 = arith.constant 0 : index
    %c0_13 = arith.constant 0 : index
    %20 = vector.load %arg5[%c0_11, %c0_12, %c0_13] : memref<1x8x128xf32, #tpu.memory_space<vmem>>, vector<1x8x128xf32>
    tpu.vector_store %arg5[%c0_11, %c0_12, %c0_13], %19 {strides = array<i32>} : memref<1x8x128xf32, #tpu.memory_space<vmem>>, vector<1x8x128xf32>,
    return
  }
  func.func @transform_0(%arg0: i32, %arg1: i32) -> (i32, i32) {
    %c0_i32 = arith.constant 0 : i32
    return %arg0, %arg1 : i32, i32
  }
  func.func @transform_1(%arg0: i32, %arg1: i32) -> (i32, i32) {
    %c0_i32 = arith.constant 0 : i32
    return %arg0, %arg1 : i32, i32
  }
  func.func @transform_2(%arg0: i32, %arg1: i32) -> (i32, i32) {
    %c0_i32 = arith.constant 0 : i32
    return %arg0, %arg1 : i32, i32
  }
  func.func @transform_3(%arg0: i32, %arg1: i32) -> (i32, i32, i32) {
    %c0_i32 = arith.constant 0 : i32
    %c0_i32_0 = arith.constant 0 : i32
    %c0_i32_1 = arith.constant 0 : i32
    return %arg0, %c0_i32, %c0_i32_0 : i32, i32, i32
  }
}

</mosaic_0001>

<bundles_post_ra>
// kernel: tpu_custom_call.1
= control target key start
LH: loop header
LB: loop body
LE: loop exit
PB: predicated region body
PF: predicated region fallthrough
CT: control target
= control target key end

     0   :  { %8 = vsyncpa [#allocation4], 0  ;;  %s1232_s0 = inlined_call_operand.hbm [shape: f32[256,128], index: 0, kind: input, shape index: {}]   ;;  %s1233_s1 = inlined_call_operand.hbm [shape: f32[256,128], index: 1, kind: input, shape index: {}]   ;;  %s1234_s2 = inlined_call_operand.hbm [shape: f32[256,128], index: 2, kind: input, shape index: {}]   ;;  %s1235_s3 = inlined_call_operand.hbm [shape: f32[1,8,128], index: 3, kind: output, shape index: {}]  }
   0x1   :  { %9 = vsyncpa [#allocation7], 0 }
   0x2   :  { %10 = vsyncpa [#allocation5], 0  ;;  %s923_s12 = smov [#allocation6]   ;;  %s924_s14 = smov [#allocation3]  }
   0x3   :  { %s28_s13 = sshll.u32 %s923_s12, 4  ;;  %s16_s15 = sshll.u32 %s924_s14, 4  ;;  %s29_s13 = int_to_ptr.vmem [resolvable:$true] %s28_s13  ;;  %s950_s15 = int_to_ptr.vmem [resolvable:$true] %s16_s15 }
   0x4   :  { %s829_s18 = scalar_lea.hbm %s1233_s1, 4096 }
   0x5   :  { %p830_p0 = scmp.ne.s32.totalorder %s1233_s1, %s829_s18  ;;  %p833_p1 = scmp.lt.u32.totalorder %s829_s18, %s1233_s1 }
   0x7   :  { %p835_p2 = pnand %p833_p1, %p830_p0 }
   0x9   :  { %838 = shalt.err (!%p835_p2)
}
   0xa   :  { %s839_s23 = scalar_lea.vmem %s29_s13, 4096  ;;  %p844_p4 = scmp.lt.s32.totalorder %s29_s13, %s29_s13 }
   0xb   :  { %p840_p3 = scmp.ne.s32.totalorder %s29_s13, %s839_s23  ;;  %p845_p5 = scmp.lt.s32.totalorder %s839_s23, %s839_s23 }
   0xd   :  { %p846_p6 = por %p845_p5, %p844_p4 }
   0xf   :  { %p847_p7 = pnand %p846_p6, %p840_p3 }
  0x11   :  { %850 = shalt.err (!%p847_p7)
}
  0x12   :  { %s925_s24 = smov 128   ;;  %s926_s25 = smov 8  }
  0x13   :  { %34 = dma.hbm_to_vmem [thread:$0]  %s1233_s1, 4096, %s29_s13, [#allocation7], %s925_s24, %s925_s24, %s926_s25  }
  0x14   :  { %s851_s30 = scalar_lea.hbm %s1232_s0, 4096 }
  0x15   :  { %p852_p8 = scmp.ne.s32.totalorder %s1232_s0, %s851_s30  ;;  %p855_p9 = scmp.lt.u32.totalorder %s851_s30, %s1232_s0 }
  0x17   :  { %p857_p10 = pnand %p855_p9, %p852_p8 }
  0x19   :  { %860 = shalt.err (!%p857_p10)
}
  0x1a   :  { %s861_s8 = scalar_lea.vmem %s950_s15, 4096  ;;  %p866_p12 = scmp.lt.s32.totalorder %s950_s15, %s950_s15 }
  0x1b   :  { %p862_p11 = scmp.ne.s32.totalorder %s950_s15, %s861_s8  ;;  %p867_p13 = scmp.lt.s32.totalorder %s861_s8, %s861_s8 }
  0x1d   :  { %p868_p0 = por %p867_p13, %p866_p12 }
  0x1f   :  { %p869_p1 = pnand %p868_p0, %p862_p11 }
  0x21   :  { %872 = shalt.err (!%p869_p1)
}
  0x22   :  { %22 = dma.hbm_to_vmem [thread:$0]  %s1232_s0, 4096, %s950_s15, [#allocation4], %s925_s24, %s925_s24, %s926_s25  }
  0x23   :  { %s927_s10 = smov [#allocation8]   ;;  %s873_s14 = scalar_lea.hbm %s1234_s2, 4096 }
  0x24   :  { %s40_s11 = sshll.u32 %s927_s10, 4  ;;  %p874_p2 = scmp.ne.s32.totalorder %s1234_s2, %s873_s14  ;;  %s41_s11 = int_to_ptr.vmem [resolvable:$true] %s40_s11 }
  0x25   :  { %p877_p3 = scmp.lt.u32.totalorder %s873_s14, %s1234_s2 }
  0x27   :  { %p879_p4 = pnand %p877_p3, %p874_p2 }
  0x29   :  { %882 = shalt.err (!%p879_p4)
}
  0x2a   :  { %s883_s20 = scalar_lea.vmem %s41_s11, 4096  ;;  %p888_p6 = scmp.lt.s32.totalorder %s41_s11, %s41_s11 }
  0x2b   :  { %p884_p5 = scmp.ne.s32.totalorder %s41_s11, %s883_s20  ;;  %p889_p7 = scmp.lt.s32.totalorder %s883_s20, %s883_s20 }
  0x2d   :  { %p890_p8 = por %p889_p7, %p888_p6 }
  0x2f   :  { %p891_p9 = pnand %p890_p8, %p884_p5 }
  0x31   :  { %894 = shalt.err (!%p891_p9)
}
  0x32   :  { %46 = dma.hbm_to_vmem [thread:$0]  %s1234_s2, 4096, %s41_s11, [#allocation7], %s925_s24, %s925_s24, %s926_s25  }
  0x33   :  { %917 = dma.done.wait [#allocation4], 4096  }
  0x34   :  { %918 = vsyncadd [#allocation4], 4294963200 }
  0x35   :  { %919 = dma.done.wait [#allocation7], 8192  }
  0x36   :  { %920 = vsyncadd [#allocation7], 4294959104  ;;  %v928_v0 = vmov 1.0|1.0   ;;  %v56_v1 = vld [vmem:[#allocation3] sm:$0xff]  ;;  %v57_v8 = vld [vmem:[#allocation3 + $0x8] sm:$0xff] }
  0x37   :  { %788 = vmatprep.subr.bf16.mxu0 %v928_v0  ;;  %804 = vmatprep.subr.bf16.mxu1 %v928_v0  ;;  %v88_v2 = vld [vmem:[#allocation6] sm:$0xff]  ;;  %v89_v9 = vld [vmem:[#allocation6 + $0x8] sm:$0xff]  ;;  %v58_v11 = vld [vmem:[#allocation3 + $0x10] sm:$0xff]  ;;  %vm569_vm0 = vcmask 7168   ;;  %s929_s2 = smov [#allocation9]  }
  0x38   :  { %789 = vmatpush3.bf16.msra.mxu0 %v928_v0  ;;  %812 = vmatpush3.bf16.msra.mxu1 %v928_v0  ;;  %v152_v3 = vld [vmem:[#allocation8] sm:$0xff]  ;;  %v120_v4 = vsub.f32 %v56_v1, %v88_v2  ;;  %v153_v10 = vld [vmem:[#allocation8 + $0x8] sm:$0xff]  ;;  %v90_v12 = vld [vmem:[#allocation6 + $0x10] sm:$0xff]  ;;  %v121_v21 = vsub.f32 %v57_v8, %v89_v9  ;;  %s650_s21 = sshll.u32 %s929_s2, 4  ;;  %s651_s21 = int_to_ptr.vmem [resolvable:$true] %s650_s21 }
  0x39   :  { %790 = vmatprep.subr.bf16.mxu0 %v928_v0  ;;  %805 = vmatprep.subr.bf16.mxu1 %v928_v0  ;;  %v184_v5 = vsub.f32 %v56_v1, %v152_v3  ;;  %v154_v13 = vld [vmem:[#allocation8 + $0x10] sm:$0xff]  ;;  %v59_v14 = vld [vmem:[#allocation3 + $0x18] sm:$0xff]  ;;  %v60_v18 = vld [vmem:[#allocation3 + $0x20] sm:$0xff]  ;;  %v185_v22 = vsub.f32 %v57_v8, %v153_v10  ;;  %v122_v32 = vsub.f32 %v58_v11, %v90_v12  ;;  %s895_s23 = scalar_lea.vmem %s651_s21, 128  ;;  %p900_p11 = scmp.lt.s32.totalorder %s651_s21, %s651_s21 }
  0x3a   :  { %v216_v6 = vmul.f32 %v120_v4, %v120_v4  ;;  %v91_v15 = vld [vmem:[#allocation6 + $0x18] sm:$0xff]  ;;  %v92_v19 = vld [vmem:[#allocation6 + $0x20] sm:$0xff]  ;;  %v61_v23 = vld [vmem:[#allocation3 + $0x28] sm:$0xff]  ;;  %v186_v33 = vsub.f32 %v58_v11, %v154_v13  ;;  %v1019_v39 = vmul.f32 %v121_v21, %v121_v21  ;;  %p896_p10 = scmp.ne.s32.totalorder %s651_s21, %s895_s23  ;;  %p901_p12 = scmp.lt.s32.totalorder %s895_s23, %s895_s23 }
  0x3b   :  { %v248_v7 = vmul.f32 %v184_v5, %v184_v5  ;;  %v155_v16 = vld [vmem:[#allocation8 + $0x18] sm:$0xff]  ;;  %v156_v20 = vld [vmem:[#allocation8 + $0x20] sm:$0xff]  ;;  %v93_v24 = vld [vmem:[#allocation6 + $0x28] sm:$0xff]  ;;  %v123_v34 = vsub.f32 %v59_v14, %v91_v15  ;;  %v1021_v40 = vmul.f32 %v185_v22, %v185_v22  ;;  %v124_v41 = vsub.f32 %v60_v18, %v92_v19 }
  0x3c   :  { %791 = vmatpush3.bf16.msra.mxu0 %v928_v0  ;;  %813 = vmatpush3.bf16.msra.mxu1 %v928_v0  ;;  %v157_v25 = vld [vmem:[#allocation8 + $0x28] sm:$0xff]  ;;  %v62_v26 = vld [vmem:[#allocation3 + $0x30] sm:$0xff]  ;;  %v63_v29 = vld [vmem:[#allocation3 + $0x38] sm:$0xff]  ;;  %v187_v35 = vsub.f32 %v59_v14, %v155_v16  ;;  %v188_v42 = vsub.f32 %v60_v18, %v156_v20  ;;  %v125_v43 = vsub.f32 %v61_v23, %v93_v24  ;;  %p902_p13 = por %p901_p12, %p900_p11 }
  0x3d   :  { %792 = vmatprep.subr.bf16.mxu0 %v928_v0  ;;  %806 = vmatprep.subr.bf16.mxu1 %v928_v0  ;;  %v280_v17 = vsub.f32 %v216_v6, %v248_v7  ;;  %v94_v27 = vld [vmem:[#allocation6 + $0x30] sm:$0xff]  ;;  %v95_v30 = vld [vmem:[#allocation6 + $0x38] sm:$0xff]  ;;  %v64_v36 = vld [vmem:[#allocation3 + $0x40] sm:$0xff]  ;;  %v189_v44 = vsub.f32 %v61_v23, %v157_v25  ;;  %v1026_v54 = vmul.f32 %v122_v32, %v122_v32 }
  0x3e   :  { %v158_v28 = vld [vmem:[#allocation8 + $0x30] sm:$0xff]  ;;  %v159_v31 = vld [vmem:[#allocation8 + $0x38] sm:$0xff]  ;;  %v96_v37 = vld [vmem:[#allocation6 + $0x40] sm:$0xff]  ;;  %v126_v45 = vsub.f32 %v62_v26, %v94_v27  ;;  %v127_v50 = vsub.f32 %v63_v29, %v95_v30  ;;  %v1028_v55 = vmul.f32 %v186_v33, %v186_v33  ;;  %v1030_v56 = vmul.f32 %v123_v34, %v123_v34  ;;  %p903_p0 = pnand %p902_p13, %p896_p10 }
  0x3f   :  { %740 = vmatprep.mubr.f32.mxu0 %v280_v17  ;;  %v160_v38 = vld [vmem:[#allocation8 + $0x40] sm:$0xff]  ;;  %v190_v46 = vsub.f32 %v62_v26, %v158_v28  ;;  %v65_v47 = vld [vmem:[#allocation3 + $0x48] sm:$0xff]  ;;  %v191_v51 = vsub.f32 %v63_v29, %v159_v31  ;;  %v128_v52 = vsub.f32 %v64_v36, %v96_v37  ;;  %v1032_v57 = vmul.f32 %v187_v35, %v187_v35  ;;  %v66_v62 = vld [vmem:[#allocation3 + $0x50] sm:$0xff] }
  0x40   :  { %793 = vmatpush3.bf16.msra.mxu0 %v928_v0  ;;  %814 = vmatpush3.bf16.msra.mxu1 %v928_v0  ;;  %v97_v48 = vld [vmem:[#allocation6 + $0x48] sm:$0xff]  ;;  %v192_v53 = vsub.f32 %v64_v36, %v160_v38  ;;  %v1035_v58 = vmul.f32 %v124_v41, %v124_v41  ;;  %v1037_v59 = vmul.f32 %v188_v42, %v188_v42  ;;  %v98_v63 = vld [vmem:[#allocation6 + $0x50] sm:$0xff]  ;;  %v67_v10 = vld [vmem:[#allocation3 + $0x58] sm:$0xff] }
  0x41   :  { %794 = vmatprep.subr.bf16.mxu0 %v928_v0  ;;  %807 = vmatprep.subr.bf16.mxu1 %v928_v0  ;;  %v161_v49 = vld [vmem:[#allocation8 + $0x48] sm:$0xff]  ;;  %v129_v60 = vsub.f32 %v65_v47, %v97_v48  ;;  %v1041_v1 = vmul.f32 %v125_v43, %v125_v43  ;;  %v1043_v2 = vmul.f32 %v189_v44, %v189_v44  ;;  %v162_v9 = vld [vmem:[#allocation8 + $0x50] sm:$0xff]  ;;  %v99_v11 = vld [vmem:[#allocation6 + $0x58] sm:$0xff] }
  0x42   :  { %v193_v61 = vsub.f32 %v65_v47, %v161_v49  ;;  %v1045_v3 = vmul.f32 %v126_v45, %v126_v45  ;;  %v1047_v4 = vmul.f32 %v190_v46, %v190_v46  ;;  %v1050_v5 = vmul.f32 %v127_v50, %v127_v50  ;;  %v163_v13 = vld [vmem:[#allocation8 + $0x58] sm:$0xff]  ;;  %v1059_v14 = vld [vmem:[#allocation3 + $0x60] sm:$0xff]  ;;  %v73_v27 = vld [vmem:[#allocation3 + $0x88] sm:$0xff] }
  0x43   :  { %v1052_v6 = vmul.f32 %v191_v51, %v191_v51  ;;  %v1054_v7 = vmul.f32 %v128_v52, %v128_v52  ;;  %v1056_v8 = vmul.f32 %v192_v53, %v192_v53  ;;  %v130_v12 = vsub.f32 %v66_v62, %v98_v63  ;;  %v100_v15 = vld [vmem:[#allocation6 + $0x60] sm:$0xff]  ;;  %v105_v28 = vld [vmem:[#allocation6 + $0x88] sm:$0xff]  ;;  %v74_v34 = vld [vmem:[#allocation3 + $0x90] sm:$0xff] }
  0x44   :  { %795 = vmatpush3.bf16.msra.mxu0 %v928_v0  ;;  %815 = vmatpush3.bf16.msra.mxu1 %v928_v0  ;;  %v281_v16 = vsub.f32 %v1019_v39, %v1021_v40  ;;  %v282_v17 = vsub.f32 %v1026_v54, %v1028_v55  ;;  %v1065_v18 = vmul.f32 %v129_v60, %v129_v60  ;;  %v72_v20 = vld [vmem:[#allocation3 + $0x80] sm:$0xff]  ;;  %v169_v29 = vld [vmem:[#allocation8 + $0x88] sm:$0xff]  ;;  %v106_v35 = vld [vmem:[#allocation6 + $0x90] sm:$0xff] }
  0x45   :  { %796 = vmatprep.subr.bf16.mxu0 %v928_v0  ;;  %808 = vmatprep.subr.bf16.mxu1 %v928_v0  ;;  %v1067_v19 = vmul.f32 %v193_v61, %v193_v61  ;;  %v104_v21 = vld [vmem:[#allocation6 + $0x80] sm:$0xff]  ;;  %v283_v23 = vsub.f32 %v1030_v56, %v1032_v57  ;;  %v284_v24 = vsub.f32 %v1035_v58, %v1037_v59  ;;  %v170_v36 = vld [vmem:[#allocation8 + $0x90] sm:$0xff]  ;;  %v75_v41 = vld [vmem:[#allocation3 + $0x98] sm:$0xff] }
  0x46   :  { %v168_v22 = vld [vmem:[#allocation8 + $0x80] sm:$0xff]  ;;  %v285_v25 = vsub.f32 %v1041_v1, %v1043_v2  ;;  %v286_v26 = vsub.f32 %v1045_v3, %v1047_v4  ;;  %v287_v30 = vsub.f32 %v1050_v5, %v1052_v6  ;;  %v288_v31 = vsub.f32 %v1054_v7, %v1056_v8  ;;  %v107_v42 = vld [vmem:[#allocation6 + $0x98] sm:$0xff]  ;;  %v81_v54 = vld [vmem:[#allocation3 + $0xc8] sm:$0xff] }
  0x47   :  { %v194_v32 = vsub.f32 %v66_v62, %v162_v9  ;;  %v1084_v33 = vsub.f32 %v67_v10, %v99_v11  ;;  %v1086_v37 = vmul.f32 %v130_v12, %v130_v12  ;;  %v1088_v38 = vsub.f32 %v67_v10, %v163_v13  ;;  %v171_v47 = vld [vmem:[#allocation8 + $0x98] sm:$0xff]  ;;  %v76_v52 = vld [vmem:[#allocation3 + $0xa0] sm:$0xff]  ;;  %v77_v10 = vld [vmem:[#allocation3 + $0xa8] sm:$0xff] }
  0x48   :  { %797 = vmatpush3.bf16.msra.mxu0 %v928_v0  ;;  %816 = vmatpush3.bf16.msra.mxu1 %v928_v0  ;;  %v136_v39 = vsub.f32 %v72_v20, %v104_v21  ;;  %v200_v40 = vsub.f32 %v72_v20, %v168_v22  ;;  %v289_v43 = vsub.f32 %v1065_v18, %v1067_v19  ;;  %v108_v53 = vld [vmem:[#allocation6 + $0xa0] sm:$0xff]  ;;  %v109_v11 = vld [vmem:[#allocation6 + $0xa8] sm:$0xff]  ;;  %v78_v22 = vld [vmem:[#allocation3 + $0xb0] sm:$0xff] }
  0x49   :  { %798 = vmatprep.subr.bf16.mxu0 %v928_v0  ;;  %809 = vmatprep.subr.bf16.mxu1 %v928_v0  ;;  %v1094_v44 = vsub.f32 %v1059_v14, %v100_v15  ;;  %v137_v45 = vsub.f32 %v73_v27, %v105_v28  ;;  %v201_v46 = vsub.f32 %v73_v27, %v169_v29  ;;  %v172_v60 = vld [vmem:[#allocation8 + $0xa0] sm:$0xff]  ;;  %v173_v21 = vld [vmem:[#allocation8 + $0xa8] sm:$0xff]  ;;  %v110_v27 = vld [vmem:[#allocation6 + $0xb0] sm:$0xff] }
  0x4a   :  { %v232_v48 = vmul.f32 %v136_v39, %v136_v39  ;;  %v264_v49 = vmul.f32 %v200_v40, %v200_v40  ;;  %v138_v50 = vsub.f32 %v74_v34, %v106_v35  ;;  %v202_v51 = vsub.f32 %v74_v34, %v170_v36  ;;  %v174_v35 = vld [vmem:[#allocation8 + $0xb0] sm:$0xff]  ;;  %v79_v36 = vld [vmem:[#allocation3 + $0xb8] sm:$0xff]  ;;  %v113_v55 = vld [vmem:[#allocation6 + $0xc8] sm:$0xff] }
  0x4b   :  { %v1098_v61 = vmul.f32 %v194_v32, %v194_v32  ;;  %v233_v62 = vmul.f32 %v137_v45, %v137_v45  ;;  %v265_v63 = vmul.f32 %v201_v46, %v201_v46  ;;  %v139_v9 = vsub.f32 %v75_v41, %v107_v42  ;;  %v111_v39 = vld [vmem:[#allocation6 + $0xb8] sm:$0xff]  ;;  %v165_v2 = vld [vmem:[#allocation8 + $0x68] sm:$0xff] }
  0x4c   :  { %799 = vmatpush3.bf16.msra.mxu0 %v928_v0  ;;  %817 = vmatpush3.bf16.msra.mxu1 %v928_v0  ;;  %v296_v12 = vsub.f32 %v232_v48, %v264_v49  ;;  %v234_v13 = vmul.f32 %v138_v50, %v138_v50  ;;  %v266_v15 = vmul.f32 %v202_v51, %v202_v51  ;;  %v80_v48 = vld [vmem:[#allocation3 + $0xc0] sm:$0xff]  ;;  %v103_v5 = vld [vmem:[#allocation6 + $0x78] sm:$0xff] }
  0x4d   :  { %800 = vmatprep.subr.bf16.mxu0 %v928_v0  ;;  %810 = vmatprep.subr.bf16.mxu1 %v928_v0  ;;  %v203_v20 = vsub.f32 %v75_v41, %v171_v47  ;;  %v297_v28 = vsub.f32 %v233_v62, %v265_v63  ;;  %v235_v29 = vmul.f32 %v139_v9, %v139_v9  ;;  %v175_v41 = vld [vmem:[#allocation8 + $0xb8] sm:$0xff]  ;;  %v112_v49 = vld [vmem:[#allocation6 + $0xc0] sm:$0xff] }
  0x4e   :  { %v140_v34 = vsub.f32 %v76_v52, %v108_v53  ;;  %v204_v32 = vsub.f32 %v76_v52, %v172_v60  ;;  %764 = vmatprep.mubr.f32.mxu1 %v296_v12  ;;  %v141_v42 = vsub.f32 %v77_v10, %v109_v11  ;;  %v142_v47 = vsub.f32 %v78_v22, %v110_v27  ;;  %v176_v50 = vld [vmem:[#allocation8 + $0xc0] sm:$0xff]  ;;  %v82_v11 = vld [vmem:[#allocation3 + $0xd0] sm:$0xff]  ;;  %v167_v6 = vld [vmem:[#allocation8 + $0x78] sm:$0xff] }
  0x4f   :  { %v267_v40 = vmul.f32 %v203_v20, %v203_v20  ;;  %v206_v53 = vsub.f32 %v78_v22, %v174_v35  ;;  %v143_v60 = vsub.f32 %v79_v36, %v111_v39  ;;  %v114_v12 = vld [vmem:[#allocation6 + $0xd0] sm:$0xff]  ;;  %v208_v22 = vsub.f32 %v80_v48, %v176_v50  ;;  %v69_v35 = vld [vmem:[#allocation3 + $0x68] sm:$0xff]  ;;  %v87_v8 = vld [vmem:[#allocation3 + $0xf8] sm:$0xff] }
  0x50   :  { %801 = vmatpush3.bf16.msra.mxu0 %v928_v0  ;;  %818 = vmatpush3.bf16.msra.mxu1 %v928_v0  ;;  %v236_v45 = vmul.f32 %v140_v34, %v140_v34  ;;  %v268_v46 = vmul.f32 %v204_v32, %v204_v32  ;;  %v237_v52 = vmul.f32 %v141_v42, %v141_v42  ;;  %v178_v27 = vld [vmem:[#allocation8 + $0xd0] sm:$0xff]  ;;  %v115_v34 = vld [vmem:[#allocation6 + $0xd8] sm:$0xff] }
  0x51   :  { %802 = vmatprep.subr.bf16.mxu0 %v928_v0  ;;  %811 = vmatprep.subr.bf16.mxu1 %v928_v0  ;;  %v299_v51 = vsub.f32 %v235_v29, %v267_v40  ;;  %v238_v9 = vmul.f32 %v142_v47, %v142_v47  ;;  %v1110_v20 = vmul.f32 %v143_v60, %v143_v60  ;;  %v83_v29 = vld [vmem:[#allocation3 + $0xd8] sm:$0xff]  ;;  %v117_v60 = vld [vmem:[#allocation6 + $0xe8] sm:$0xff] }
  0x52   :  { %v300_v62 = vsub.f32 %v236_v45, %v268_v46  ;;  %v179_v32 = vld [vmem:[#allocation8 + $0xd8] sm:$0xff]  ;;  %v146_v39 = vsub.f32 %v82_v11, %v114_v12  ;;  %v1121_v40 = vmul.f32 %v1088_v38, %v1088_v38  ;;  %v84_v45 = vld [vmem:[#allocation3 + $0xe0] sm:$0xff]  ;;  %v1129_v1 = vmul.f32 %v1094_v44, %v1094_v44  ;;  %v85_v44 = vld [vmem:[#allocation3 + $0xe8] sm:$0xff] }
  0x53   :  { %v116_v46 = vld [vmem:[#allocation6 + $0xe0] sm:$0xff]  ;;  %v147_v47 = vsub.f32 %v83_v29, %v115_v34 }
  0x54   :  { %803 = vmatpush3.bf16.msra.mxu0 %v928_v0  ;;  %819 = vmatpush3.bf16.msra.mxu1 %v928_v0  ;;  %v298_v0 = vsub.f32 %v234_v13, %v266_v15  ;;  %v164_v13 = vld [vmem:[#allocation8 + $0x60] sm:$0xff]  ;;  %v270_v15 = vmul.f32 %v206_v53, %v206_v53  ;;  %v148_v4 = vsub.f32 %v84_v45, %v116_v46 }
  0x55   :  { %v196_v42 = vsub.f32 %v1059_v14, %v164_v13  ;;  %v166_v14 = vld [vmem:[#allocation8 + $0x70] sm:$0xff] }
  0x56   :  { %v302_v58 = vsub.f32 %v238_v9, %v270_v15  ;;  %v86_v9 = vld [vmem:[#allocation3 + $0xf0] sm:$0xff]  ;;  %v71_v15 = vld [vmem:[#allocation3 + $0x78] sm:$0xff] }
  0x57   :  { %741 = vmatmul.mubr.f32.vlgmr.msra.gmra.mrb[0].mxu0 %v281_v16  ;;  %765 = vmatmul.mubr.f32.vlgmr.msra.gmra.mrb[0].mxu1 %v297_v28  ;;  %v205_v16 = vsub.f32 %v77_v10, %v173_v21  ;;  %v207_v10 = vsub.f32 %v79_v36, %v175_v41  ;;  %v144_v21 = vsub.f32 %v80_v48, %v112_v49  ;;  %v101_v36 = vld [vmem:[#allocation6 + $0x68] sm:$0xff] }
  0x58   :  { %743 = vmatprep.mubr.f32.mxu0 %v282_v17  ;;  %767 = vmatprep.mubr.f32.mxu1 %v298_v0  ;;  %v177_v17 = vld [vmem:[#allocation8 + $0xc8] sm:$0xff]  ;;  %v1117_v0 = vmul.f32 %v1084_v33, %v1084_v33  ;;  %v210_v41 = vsub.f32 %v82_v11, %v178_v27  ;;  %v102_v33 = vld [vmem:[#allocation6 + $0x70] sm:$0xff]  ;;  %v211_v48 = vsub.f32 %v83_v29, %v179_v32 }
  0x59   :  { %v269_v63 = vmul.f32 %v205_v16, %v205_v16  ;;  %v271_v57 = vmul.f32 %v207_v10, %v207_v10  ;;  %v209_v28 = vsub.f32 %v81_v54, %v177_v17  ;;  %v240_v59 = vmul.f32 %v144_v21, %v144_v21  ;;  %v180_v16 = vld [vmem:[#allocation8 + $0xe0] sm:$0xff]  ;;  %v118_v10 = vld [vmem:[#allocation6 + $0xf0] sm:$0xff] }
  0x5a   :  { %v133_v53 = vsub.f32 %v69_v35, %v101_v36  ;;  %v260_v17 = vmul.f32 %v196_v42, %v196_v42  ;;  %v182_v11 = vld [vmem:[#allocation8 + $0xf0] sm:$0xff]  ;;  %v291_v12 = vsub.f32 %v1117_v0, %v1121_v40  ;;  %v149_v21 = vsub.f32 %v85_v44, %v117_v60 }
  0x5b   :  { %744 = vmatmul.mubr.f32.gmra.mrb[2].mxu0 %v283_v23  ;;  %768 = vmatmul.mubr.f32.gmra.mrb[2].mxu1 %v299_v51  ;;  %v301_v56 = vsub.f32 %v237_v52, %v269_v63  ;;  %v145_v23 = vsub.f32 %v81_v54, %v113_v55  ;;  %v303_v38 = vsub.f32 %v1110_v20, %v271_v57  ;;  %v181_v54 = vld [vmem:[#allocation8 + $0xe8] sm:$0xff] }
  0x5c   :  { %746 = vmatprep.mubr.f32.mxu0 %v284_v24  ;;  %770 = vmatprep.mubr.f32.mxu1 %v300_v62  ;;  %v272_v24 = vmul.f32 %v208_v22, %v208_v22  ;;  %v273_v50 = vmul.f32 %v209_v28, %v209_v28  ;;  %v242_v51 = vmul.f32 %v146_v39, %v146_v39 }
  0x5d   :  { %v241_v49 = vmul.f32 %v145_v23, %v145_v23  ;;  %v274_v52 = vmul.f32 %v210_v41, %v210_v41  ;;  %v290_v55 = vsub.f32 %v1086_v37, %v1098_v61  ;;  %v197_v62 = vsub.f32 %v69_v35, %v165_v2  ;;  %v183_v23 = vld [vmem:[#allocation8 + $0xf8] sm:$0xff] }
  0x5e   :  { %v304_v3 = vsub.f32 %v240_v59, %v272_v24  ;;  %v275_v20 = vmul.f32 %v211_v48, %v211_v48  ;;  %v213_v22 = vsub.f32 %v85_v44, %v181_v54  ;;  %v244_v27 = vmul.f32 %v148_v4, %v148_v4 }
  0x5f   :  { %747 = vmatmul.mubr.f32.gmra.mrb[4].mxu0 %v285_v25  ;;  %v70_v25 = vld [vmem:[#allocation3 + $0x70] sm:$0xff]  ;;  %771 = vmatmul.mubr.f32.gmra.mrb[4].mxu1 %v301_v56  ;;  %v305_v37 = vsub.f32 %v241_v49, %v273_v50  ;;  %v306_v61 = vsub.f32 %v242_v51, %v274_v52  ;;  %v150_v57 = vsub.f32 %v86_v9, %v118_v10 }
  0x60   :  { %749 = vmatprep.mubr.f32.mxu0 %v286_v26  ;;  %773 = vmatprep.mubr.f32.mxu1 %v302_v58  ;;  %v212_v26 = vsub.f32 %v84_v45, %v180_v16  ;;  %v134_v63 = vsub.f32 %v70_v25, %v102_v33  ;;  %v198_v13 = vsub.f32 %v70_v25, %v166_v14 }
  0x61   :  { %v214_v7 = vsub.f32 %v86_v9, %v182_v11  ;;  %v229_v28 = vmul.f32 %v133_v53, %v133_v53  ;;  %v261_v29 = vmul.f32 %v197_v62, %v197_v62  ;;  %v135_v34 = vsub.f32 %v71_v15, %v103_v5 }
  0x62   :  { %v276_v56 = vmul.f32 %v212_v26, %v212_v26  ;;  %v199_v32 = vsub.f32 %v71_v15, %v167_v6  ;;  %v292_v35 = vsub.f32 %v1129_v1, %v260_v17  ;;  %v230_v36 = vmul.f32 %v134_v63, %v134_v63 }
  0x63   :  { %750 = vmatmul.mubr.f32.gmra.mrb[6].mxu0 %v287_v30  ;;  %v243_v30 = vmul.f32 %v147_v47, %v147_v47  ;;  %774 = vmatmul.mubr.f32.gmra.mrb[6].mxu1 %v303_v38  ;;  %v262_v58 = vmul.f32 %v198_v13, %v198_v13  ;;  %v245_v24 = vmul.f32 %v149_v21, %v149_v21 }
  0x64   :  { %752 = vmatprep.mubr.f32.mxu0 %v288_v31  ;;  %776 = vmatprep.mubr.f32.mxu1 %v304_v3  ;;  %v119_v31 = vld [vmem:[#allocation6 + $0xf8] sm:$0xff]  ;;  %v277_v39 = vmul.f32 %v213_v22, %v213_v22  ;;  %v215_v40 = vsub.f32 %v87_v8, %v183_v23  ;;  %v308_v42 = vsub.f32 %v244_v27, %v276_v56 }
  0x65   :  { %v307_v59 = vsub.f32 %v243_v30, %v275_v20  ;;  %v151_v0 = vsub.f32 %v87_v8, %v119_v31  ;;  %v246_v41 = vmul.f32 %v150_v57, %v150_v57  ;;  %v278_v18 = vmul.f32 %v214_v7, %v214_v7 }
  0x66   :  { %v293_v19 = vsub.f32 %v229_v28, %v261_v29  ;;  %v263_v45 = vmul.f32 %v199_v32, %v199_v32  ;;  %v294_v46 = vsub.f32 %v230_v36, %v262_v58  ;;  %v309_v16 = vsub.f32 %v245_v24, %v277_v39 }
  0x67   :  { %753 = vmatmul.mubr.f32.gmra.mrb[8].mxu0 %v289_v43  ;;  %777 = vmatmul.mubr.f32.gmra.mrb[8].mxu1 %v305_v37  ;;  %v231_v43 = vmul.f32 %v135_v34, %v135_v34  ;;  %v247_v1 = vmul.f32 %v151_v0, %v151_v0  ;;  %v279_v2 = vmul.f32 %v215_v40, %v215_v40 }
  0x68   :  { %755 = vmatprep.mubr.f32.mxu0 %v290_v55  ;;  %779 = vmatprep.mubr.f32.mxu1 %v306_v61  ;;  %v310_v25 = vsub.f32 %v246_v41, %v278_v18 }
  0x69   :  { %v295_v33 = vsub.f32 %v231_v43, %v263_v45  ;;  %v311_v38 = vsub.f32 %v247_v1, %v279_v2 }
  0x6b   :  { %756 = vmatmul.mubr.f32.gmra.mrb[10].mxu0 %v291_v12  ;;  %780 = vmatmul.mubr.f32.gmra.mrb[10].mxu1 %v307_v59 }
  0x6c   :  { %758 = vmatprep.mubr.f32.mxu0 %v292_v35  ;;  %782 = vmatprep.mubr.f32.mxu1 %v308_v42 }
  0x6f   :  { %759 = vmatmul.mubr.f32.gmra.mrb[12].mxu0 %v293_v19  ;;  %783 = vmatmul.mubr.f32.gmra.mrb[12].mxu1 %v309_v16 }
  0x70   :  { %761 = vmatprep.mubr.f32.mxu0 %v294_v46  ;;  %785 = vmatprep.mubr.f32.mxu1 %v310_v25 }
  0x73   :  { %762 = vmatmul.mubr.f32.gmra.mrb[14].mxu0 %v295_v33  ;;  %786 = vmatmul.mubr.f32.gmra.mrb[14].mxu1 %v311_v38 }
 0x12a   :  { %v742_v47 = vpop.f32.mrb[0].mxu0  ;;  %v1146_v50 = vpop.f32.mrb[0].mxu1 }
 0x12b   :  { %v384_v48 = vadd.f32 1.0, %v742_v47  ;;  %v378_v14 = vpop.f32.mrb[1].mxu0  ;;  %v1148_v52 = vpop.f32.mrb[1].mxu1 }
 0x12c   :  { %v379_v49 = vadd.f32 1.0, %v378_v14 }
 0x12d   :  { %v538_v51 = vmax.f32 %v384_v48, 0.0 }
 0x12e   :  { %v537_v53 = vmax.f32 %v379_v49, 0.0  ;;  %v745_v3 = vpop.f32.mrb[2].mxu0  ;;  %v1152_v55 = vpop.f32.mrb[2].mxu1 }
 0x12f   :  { %v571_v4 = vsel %vm569_vm0, %v538_v51, 0.0  ;;  %v394_v26 = vadd.f32 1.0, %v745_v3  ;;  %v388_v44 = vpop.f32.mrb[3].mxu0  ;;  %v1154_v62 = vpop.f32.mrb[3].mxu1 }
 0x130   :  { %v570_v60 = vsel %vm569_vm0, %v537_v53, 0.0  ;;  %v389_v54 = vadd.f32 1.0, %v388_v44 }
 0x131   :  { %v572_v17 = vadd.f32 %v571_v4, %v570_v60  ;;  %v540_v63 = vmax.f32 %v394_v26, 0.0  ;;  %v459_v60 = vadd.f32 1.0, %v1148_v52 }
 0x132   :  { %v539_v9 = vmax.f32 %v389_v54, 0.0  ;;  %v748_v10 = vpop.f32.mrb[4].mxu0  ;;  %v1157_v5 = vpop.f32.mrb[4].mxu1 }
 0x133   :  { %v404_v11 = vadd.f32 1.0, %v748_v10  ;;  %v398_v12 = vpop.f32.mrb[5].mxu0  ;;  %v1159_v30 = vpop.f32.mrb[5].mxu1  ;;  %v575_v20 = vsel %vm569_vm0, %v540_v63, 0.0 }
 0x134   :  { %v573_v13 = vsel %vm569_vm0, %v539_v9, 0.0  ;;  %v399_v15 = vadd.f32 1.0, %v398_v12 }
 0x135   :  { %v574_v6 = vadd.f32 %v573_v13, %v572_v17  ;;  %v542_v37 = vmax.f32 %v404_v11, 0.0 }
 0x136   :  { %v541_v61 = vmax.f32 %v399_v15, 0.0  ;;  %v751_v21 = vpop.f32.mrb[6].mxu0  ;;  %v1163_v8 = vpop.f32.mrb[6].mxu1 }
 0x137   :  { %v576_v22 = vadd.f32 %v575_v20, %v574_v6  ;;  %v414_v27 = vadd.f32 1.0, %v751_v21  ;;  %v408_v56 = vpop.f32.mrb[7].mxu0  ;;  %v1165_v23 = vpop.f32.mrb[7].mxu1  ;;  %v579_v28 = vsel %vm569_vm0, %v542_v37, 0.0  ;;  %v553_v21 = vmax.f32 %v459_v60, 0.0 }
 0x138   :  { %v577_v57 = vsel %vm569_vm0, %v541_v61, 0.0  ;;  %v409_v7 = vadd.f32 1.0, %v408_v56  ;;  %v464_v61 = vadd.f32 1.0, %v1146_v50 }
 0x139   :  { %v578_v31 = vadd.f32 %v577_v57, %v576_v22  ;;  %v544_v29 = vmax.f32 %v414_v27, 0.0  ;;  %v469_v57 = vadd.f32 1.0, %v1154_v62 }
 0x13a   :  { %v543_v34 = vmax.f32 %v409_v7, 0.0  ;;  %v754_v32 = vpop.f32.mrb[8].mxu0  ;;  %v1169_v39 = vpop.f32.mrb[8].mxu1 }
 0x13b   :  { %v580_v35 = vadd.f32 %v579_v28, %v578_v31  ;;  %v424_v36 = vadd.f32 1.0, %v754_v32  ;;  %v418_v58 = vpop.f32.mrb[9].mxu0  ;;  %v1171_v40 = vpop.f32.mrb[9].mxu1  ;;  %v583_v42 = vsel %vm569_vm0, %v544_v29, 0.0  ;;  %v554_v29 = vmax.f32 %v464_v61, 0.0 }
 0x13c   :  { %v581_v59 = vsel %vm569_vm0, %v543_v34, 0.0  ;;  %v419_v24 = vadd.f32 1.0, %v418_v58  ;;  %v474_v34 = vadd.f32 1.0, %v1152_v55  ;;  %v555_v50 = vmax.f32 %v469_v57, 0.0 }
 0x13d   :  { %v582_v0 = vadd.f32 %v581_v59, %v580_v35  ;;  %v546_v41 = vmax.f32 %v424_v36, 0.0  ;;  %v601_v35 = vsel %vm569_vm0, %v553_v21, 0.0  ;;  %v479_v36 = vadd.f32 1.0, %v1159_v30 }
 0x13e   :  { %v545_v18 = vmax.f32 %v419_v24, 0.0  ;;  %v757_v19 = vpop.f32.mrb[10].mxu0  ;;  %v1175_v2 = vpop.f32.mrb[10].mxu1  ;;  %v556_v24 = vmax.f32 %v474_v34, 0.0  ;;  %v603_v62 = vsel %vm569_vm0, %v554_v29, 0.0  ;;  %v494_v30 = vadd.f32 1.0, %v1163_v8 }
 0x13f   :  { %v584_v43 = vadd.f32 %v583_v42, %v582_v0  ;;  %v434_v45 = vadd.f32 1.0, %v757_v19  ;;  %v428_v46 = vpop.f32.mrb[11].mxu0  ;;  %v1177_v33 = vpop.f32.mrb[11].mxu1  ;;  %v587_v38 = vsel %vm569_vm0, %v546_v41, 0.0  ;;  %v484_v0 = vadd.f32 1.0, %v1157_v5 }
 0x140   :  { %v585_v16 = vsel %vm569_vm0, %v545_v18, 0.0  ;;  %v429_v1 = vadd.f32 1.0, %v428_v46  ;;  %v605_v42 = vsel %vm569_vm0, %v555_v50, 0.0  ;;  %v557_v41 = vmax.f32 %v479_v36, 0.0 }
 0x141   :  { %v586_v25 = vadd.f32 %v585_v16, %v584_v43  ;;  %v548_v47 = vmax.f32 %v434_v45, 0.0  ;;  %v489_v18 = vadd.f32 1.0, %v1165_v23  ;;  %v607_v19 = vsel %vm569_vm0, %v556_v24, 0.0 }
 0x142   :  { %v547_v48 = vmax.f32 %v429_v1, 0.0  ;;  %v760_v14 = vpop.f32.mrb[12].mxu0  ;;  %v1181_v26 = vpop.f32.mrb[12].mxu1  ;;  %v558_v45 = vmax.f32 %v484_v0, 0.0  ;;  %v609_v46 = vsel %vm569_vm0, %v557_v41, 0.0  ;;  %v499_v1 = vadd.f32 1.0, %v1171_v40 }
 0x143   :  { %v588_v49 = vadd.f32 %v587_v38, %v586_v25  ;;  %v444_v51 = vadd.f32 1.0, %v760_v14  ;;  %v438_v53 = vpop.f32.mrb[13].mxu0  ;;  %v518_v54 = vpop.f32.mrb[13].mxu1  ;;  %v591_v17 = vsel %vm569_vm0, %v548_v47, 0.0  ;;  %v559_v16 = vmax.f32 %v489_v18, 0.0 }
 0x144   :  { %v589_v3 = vsel %vm569_vm0, %v547_v48, 0.0  ;;  %v439_v4 = vadd.f32 1.0, %v438_v53  ;;  %v611_v25 = vsel %vm569_vm0, %v558_v45, 0.0  ;;  %v504_v47 = vadd.f32 1.0, %v1169_v39 }
 0x145   :  { %v590_v44 = vadd.f32 %v589_v3, %v588_v49  ;;  %v550_v63 = vmax.f32 %v444_v51, 0.0  ;;  %v560_v48 = vmax.f32 %v494_v30, 0.0  ;;  %v613_v23 = vsel %vm569_vm0, %v559_v16, 0.0 }
 0x146   :  { %v549_v9 = vmax.f32 %v439_v4, 0.0  ;;  %v763_v10 = vpop.f32.mrb[14].mxu0  ;;  %v1186_v20 = vpop.f32.mrb[14].mxu1  ;;  %v561_v14 = vmax.f32 %v499_v1, 0.0  ;;  %v509_v49 = vadd.f32 1.0, %v1177_v33  ;;  %v562_v3 = vmax.f32 %v504_v47, 0.0 }
 0x147   :  { %v592_v11 = vadd.f32 %v591_v17, %v590_v44  ;;  %v454_v12 = vadd.f32 1.0, %v763_v10  ;;  %v448_v13 = vpop.f32.mrb[15].mxu0  ;;  %v528_v22 = vpop.f32.mrb[15].mxu1  ;;  %v595_v52 = vsel %vm569_vm0, %v550_v63, 0.0  ;;  %v514_v8 = vadd.f32 1.0, %v1175_v2 }
 0x148   :  { %v593_v15 = vsel %vm569_vm0, %v549_v9, 0.0  ;;  %v449_v6 = vadd.f32 1.0, %v448_v13  ;;  %v615_v4 = vsel %vm569_vm0, %v560_v48, 0.0  ;;  %v617_v40 = vsel %vm569_vm0, %v561_v14, 0.0 }
 0x149   :  { %v594_v37 = vadd.f32 %v593_v15, %v592_v11  ;;  %v552_v27 = vmax.f32 %v454_v12, 0.0  ;;  %v563_v44 = vmax.f32 %v509_v49, 0.0  ;;  %v519_v60 = vadd.f32 1.0, %v518_v54 }
 0x14a   :  { %v551_v56 = vmax.f32 %v449_v6, 0.0  ;;  %v619_v39 = vsel %vm569_vm0, %v562_v3, 0.0  ;;  %v564_v9 = vmax.f32 %v514_v8, 0.0  ;;  %v524_v33 = vadd.f32 1.0, %v1181_v26 }
 0x14b   :  { %v596_v7 = vadd.f32 %v595_v52, %v594_v37  ;;  %v599_v32 = vsel %vm569_vm0, %v552_v27, 0.0  ;;  %v621_v10 = vsel %vm569_vm0, %v563_v44, 0.0  ;;  %v565_v11 = vmax.f32 %v519_v60, 0.0 }
 0x14c   :  { %v597_v31 = vsel %vm569_vm0, %v551_v56, 0.0  ;;  %v529_v12 = vadd.f32 1.0, %v528_v22  ;;  %v623_v2 = vsel %vm569_vm0, %v564_v9, 0.0  ;;  %v566_v6 = vmax.f32 %v524_v33, 0.0 }
 0x14d   :  { %v598_v28 = vadd.f32 %v597_v31, %v596_v7  ;;  %v625_v37 = vsel %vm569_vm0, %v565_v11, 0.0  ;;  %v534_v54 = vadd.f32 1.0, %v1186_v20 }
 0x14e   :  { %v567_v61 = vmax.f32 %v529_v12, 0.0  ;;  %v627_v27 = vsel %vm569_vm0, %v566_v6, 0.0 }
 0x14f   :  { %v600_v58 = vadd.f32 %v599_v32, %v598_v28  ;;  %v568_v56 = vmax.f32 %v534_v54, 0.0 }
 0x150   :  { %v629_v57 = vsel %vm569_vm0, %v567_v61, 0.0 }
 0x151   :  { %v602_v59 = vadd.f32 %v601_v35, %v600_v58  ;;  %v631_v22 = vsel %vm569_vm0, %v568_v56, 0.0 }
 0x153   :  { %v604_v55 = vadd.f32 %v603_v62, %v602_v59 }
 0x155   :  { %v606_v43 = vadd.f32 %v605_v42, %v604_v55 }
 0x157   :  { %v608_v5 = vadd.f32 %v607_v19, %v606_v43 }
 0x159   :  { %v610_v38 = vadd.f32 %v609_v46, %v608_v5 }
 0x15b   :  { %v612_v51 = vadd.f32 %v611_v25, %v610_v38 }
 0x15d   :  { %v614_v53 = vadd.f32 %v613_v23, %v612_v51 }
 0x15f   :  { %v616_v17 = vadd.f32 %v615_v4, %v614_v53 }
 0x161   :  { %v618_v63 = vadd.f32 %v617_v40, %v616_v17 }
 0x163   :  { %v620_v13 = vadd.f32 %v619_v39, %v618_v63 }
 0x165   :  { %v622_v15 = vadd.f32 %v621_v10, %v620_v13 }
 0x167   :  { %v624_v21 = vadd.f32 %v623_v2, %v622_v15 }
 0x169   :  { %v626_v52 = vadd.f32 %v625_v37, %v624_v21 }
 0x16b   :  { %v628_v26 = vadd.f32 %v627_v27, %v626_v52 }
 0x16d   :  { %v630_v7 = vadd.f32 %v629_v57, %v628_v26 }
 0x16f   :  { %v632_v31 = vadd.f32 %v631_v22, %v630_v7 }
 0x171   :  { %633 = vadd.xlane.f32.xlu0 %v632_v31 }
 0x1fe   :  { %v634_v28 = vpop.xlane.xlu0 %633 }
 0x1ff   :  { %v635_v29 = vrot.slane %v634_v28, 4 }
 0x201   :  { %v636_v34 = vadd.f32 %v635_v29, %v634_v28 }
 0x203   :  { %v637_v32 = vrot.slane %v636_v34, 2 }
 0x205   :  { %v638_v35 = vadd.f32 %v637_v32, %v636_v34 }
 0x207   :  { %v639_v20 = vrot.slane %v638_v35, 1 }
 0x209   :  { %v640_v50 = vadd.f32 %v639_v20, %v638_v35 }
 0x20b   :  { %820 = vpush %v640_v50 }
 0x23c   :  { %s821_s22 = spop %820 }
 0x23d   :  { %v642_v36 = vstv %s821_s22 }
 0x23e   :  { %643 = vst [vmem:[#allocation9] sm:$0xff] %v642_v36 }
 0x23f   :  { %906 = shalt.err (!%p903_p0)
}
 0x240   :  { %s907_s26 = scalar_lea.hbm %s1235_s3, 128 }
 0x241   :  { %p908_p1 = scmp.ne.s32.totalorder %s1235_s3, %s907_s26  ;;  %p911_p2 = scmp.lt.u32.totalorder %s907_s26, %s1235_s3 }
 0x243   :  { %p913_p3 = pnand %p911_p2, %p908_p1 }
 0x245   :  { %916 = shalt.err (!%p913_p3)
}
 0x246   :  { %653 = dma.vmem_to_hbm [thread:$0]  %s651_s21, 128, %s1235_s3, [#allocation5]  }
 0x247   :  { %921 = dma.done.wait [#allocation5], 128  }
 0x248   :  { %922 = vsyncadd [#allocation5], 4294967168 }
 0x249   :  { %657 = vsyncpa [#allocation4], 1 }
 0x24a   :  { %658 = vsyncpa [#allocation7], 1 }
 0x24b   :  { %659 = vsyncpa [#allocation5], 1 }

</bundles_post_ra>
